<compile_context>
chip_gen: v5e
topology: v5e:2x2
jax: 0.10.0
libtpu: 0.0.40
codegen_flags: <defaults>
</compile_context>

<pallas_src>
import functools

import jax
import jax.numpy as jnp
from jax.experimental import pallas as pl
from jax.experimental.pallas import tpu as pltpu

LANE = 128
SUBLANE = 8
NEG_BIG = -1e30  # finite "-inf" baked into padded class-bias lanes


def _cdiv(a, b):
    return (a + b - 1) // b


def _round_up(n, m):
    return ((n + m - 1) // m) * m


def fcnet_kernel(num_classes, x_ref, w1_ref, b1_ref, w2_ref, b2_ref,
                 w3_ref, b3_ref, w4_ref, b4_ref, out_ref):
    # x streams in as f32; the bf16 cast is VPU work hidden under the matmuls.
    x = x_ref[...].astype(jnp.bfloat16)                                # (tb, D_in)

    h1 = jnp.dot(x, w1_ref[...], preferred_element_type=jnp.float32) + b1_ref[...]
    h1 = jnp.maximum(h1, 0.0).astype(jnp.bfloat16)                     # (tb, 256)

    h2 = jnp.dot(h1, w2_ref[...], preferred_element_type=jnp.float32) + b2_ref[...]
    h2 = jnp.maximum(h2, 0.0).astype(jnp.bfloat16)                     # (tb, 128)

    h3 = jnp.dot(h2, w3_ref[...], preferred_element_type=jnp.float32) + b3_ref[...]
    h3 = jnp.maximum(h3, 0.0).astype(jnp.bfloat16)                     # (tb, 128) lane-padded

    # Padded class lanes of b4 hold -1e30 (w4 padded columns are zero), so
    # exp() underflows to 0 there -- no per-step iota / select needed.
    logits = jnp.dot(h3, w4_ref[...], preferred_element_type=jnp.float32) + b4_ref[...]

    m = jnp.max(logits, axis=-1, keepdims=True)
    e = jnp.exp(logits - m)
    denom = jnp.sum(e, axis=-1, keepdims=True)
    probs = e * pl.reciprocal(denom, approx=True)

    # Store only the real class columns (block last dim == full array last dim).
    out_ref[...] = probs[:, :num_classes].astype(out_ref.dtype)


def _prepare_params(params):
    """Cast weights to bf16; zero-pad layers 3/4 to 128 lanes; bake the class
    mask into the padded lanes of b4."""
    w3 = params["w3"]
    w4 = params["w4"]
    h3_dim = w3.shape[1]
    nc = w4.shape[1]
    h3_pad = _round_up(h3_dim, LANE)
    nc_pad = _round_up(nc, LANE)

    w1 = params["w1"].astype(jnp.bfloat16)
    w2 = params["w2"].astype(jnp.bfloat16)
    w3p = (jnp.zeros((w3.shape[0], h3_pad), jnp.float32)
           .at[:, :h3_dim].set(w3).astype(jnp.bfloat16))
    w4p = (jnp.zeros((h3_pad, nc_pad), jnp.float32)
           .at[:w4.shape[0], :nc].set(w4).astype(jnp.bfloat16))

    b1 = params["b1"].astype(jnp.float32)
    b2 = params["b2"].astype(jnp.float32)
    b3p = jnp.zeros((1, h3_pad), jnp.float32).at[:, :h3_dim].set(params["b3"])
    # Padded class lanes get a huge finite negative bias -> softmax weight 0.
    b4p = (jnp.full((1, nc_pad), NEG_BIG, jnp.float32)
           .at[:, :nc].set(params["b4"]))
    return w1, b1, w2, b2, w3p, b3p, w4p, b4p, nc


def fcnet_forward(x, params, *, batch_tile=1024):
    """x: (B, input_size) f32. params: dict of (in,out) weights and (1,out) biases."""
    B, D_in = x.shape
    w1, b1, w2, b2, w3, b3, w4, b4, nc = _prepare_params(params)

    # Balance the batch across tiles (avoids padding B=300 up to a full tile),
    # and keep >=2 grid steps when there is enough work so both v7x
    # TensorCores are used; v5e/v6e simply run the steps sequentially.
    num_tiles = _cdiv(B, batch_tile)
    if B >= 2 * SUBLANE:
        num_tiles = max(num_tiles, 2)
    tb = _round_up(_cdiv(B, num_tiles), SUBLANE)
    B_pad = tb * num_tiles
    if B_pad != B:
        x = jnp.pad(x, ((0, B_pad - B), (0, 0)))

    full = lambda arr: pl.BlockSpec(arr.shape, lambda i: (0,) * arr.ndim)

    out = pl.pallas_call(
        functools.partial(fcnet_kernel, nc),
        out_shape=jax.ShapeDtypeStruct((B_pad, nc), jnp.float32),
        grid=(num_tiles,),
        in_specs=[
            pl.BlockSpec((tb, D_in), lambda i: (i, 0)),   # x streams over batch (f32)
            full(w1), full(b1),                            # weights/biases stay resident
            full(w2), full(b2),
            full(w3), full(b3),
            full(w4), full(b4),
        ],
        out_specs=pl.BlockSpec((tb, nc), lambda i: (i, 0)),  # un-padded output columns
        compiler_params=pltpu.CompilerParams(
            dimension_semantics=("parallel",)),
    )(x, w1, b1, w2, b2, w3, b3, w4, b4)

    if B_pad != B:
        out = out[:B]
    return out


def init_params(key, input_size, num_classes):
    """Deterministic init mimicking nn.Linear's U(-1/sqrt(fan_in), 1/sqrt(fan_in))."""
    dims = [(input_size, 256), (256, 128), (128, 32), (32, num_classes)]
    params = {}
    keys = jax.random.split(key, 2 * len(dims))
    for idx, (fan_in, fan_out) in enumerate(dims):
        bound = 1.0 / jnp.sqrt(fan_in)
        params[f"w{idx+1}"] = jax.random.uniform(
            keys[2 * idx], (fan_in, fan_out), jnp.float32, -bound, bound)
        params[f"b{idx+1}"] = jax.random.uniform(
            keys[2 * idx + 1], (1, fan_out), jnp.float32, -bound, bound)
    return params


def fcnet_reference(x, params):
    h = jnp.maximum(x @ params["w1"] + params["b1"], 0.0)
    h = jnp.maximum(h @ params["w2"] + params["b2"], 0.0)
    h = jnp.maximum(h @ params["w3"] + params["b3"], 0.0)
    logits = h @ params["w4"] + params["b4"]
    return jax.nn.softmax(logits, axis=-1)


if __name__ == "__main__":
    key = jax.random.PRNGKey(0)
    k_x, k_x2, k_p = jax.random.split(key, 3)

    batch, input_size, num_classes = 8, 64, 10
    params = init_params(k_p, input_size, num_classes)

    # Small batch (module-sized example): single grid step.
    x = jax.random.normal(k_x, (batch, input_size), jnp.float32)
    out = jax.block_until_ready(fcnet_forward(x, params))
    ref = fcnet_reference(x, params)
    assert out.shape == (batch, num_classes)
    assert jnp.allclose(out, ref, atol=2e-2), float(jnp.max(jnp.abs(out - ref)))
    assert jnp.allclose(jnp.sum(out, axis=-1), 1.0, atol=5e-3)

    # Larger, non-tile-aligned batch exercises the balanced multi-tile grid
    # (2 tiles of 152 rows) + row padding/slicing path.
    x2 = jax.random.normal(k_x2, (300, input_size), jnp.float32)
    out2 = jax.block_until_ready(fcnet_forward(x2, params))
    ref2 = fcnet_reference(x2, params)
    assert out2.shape == (300, num_classes)
    assert jnp.allclose(out2, ref2, atol=2e-2), float(jnp.max(jnp.abs(out2 - ref2)))
    assert jnp.allclose(jnp.sum(out2, axis=-1), 1.0, atol=5e-3)

    print("KERNEL_OK")
</pallas_src>

<mosaic_0001>
module attributes {stable_mosaic.version = 11 : i64} {
  func.func @fcnet_kernel(%arg0: i32, %arg1: memref<8x64xf32, #tpu.memory_space<vmem>>, %arg2: memref<64x256xbf16, #tpu.memory_space<vmem>>, %arg3: memref<1x256xf32, #tpu.memory_space<vmem>>, %arg4: memref<256x128xbf16, #tpu.memory_space<vmem>>, %arg5: memref<1x128xf32, #tpu.memory_space<vmem>>, %arg6: memref<128x128xbf16, #tpu.memory_space<vmem>>, %arg7: memref<1x128xf32, #tpu.memory_space<vmem>>, %arg8: memref<128x128xbf16, #tpu.memory_space<vmem>>, %arg9: memref<1x128xf32, #tpu.memory_space<vmem>>, %arg10: memref<8x10xf32, #tpu.memory_space<vmem>>) attributes {dimension_semantics = [#tpu.dimension_semantics<parallel>], iteration_bounds = array<i64: 1>, scalar_prefetch = 0 : i64, scratch_operands = 0 : i64, tpu.core_type = #tpu.core_type<tc>, window_params = [{transform_indices = @transform_0, window_bounds = array<i64: 8, 64>}, {pipeline_mode = #tpu.pipeline_mode<synchronous>, transform_indices = @transform_1, window_bounds = array<i64: 64, 256>}, {pipeline_mode = #tpu.pipeline_mode<synchronous>, transform_indices = @transform_2, window_bounds = array<i64: 1, 256>}, {pipeline_mode = #tpu.pipeline_mode<synchronous>, transform_indices = @transform_3, window_bounds = array<i64: 256, 128>}, {pipeline_mode = #tpu.pipeline_mode<synchronous>, transform_indices = @transform_4, window_bounds = array<i64: 1, 128>}, {pipeline_mode = #tpu.pipeline_mode<synchronous>, transform_indices = @transform_5, window_bounds = array<i64: 128, 128>}, {pipeline_mode = #tpu.pipeline_mode<synchronous>, transform_indices = @transform_6, window_bounds = array<i64: 1, 128>}, {pipeline_mode = #tpu.pipeline_mode<synchronous>, transform_indices = @transform_7, window_bounds = array<i64: 128, 128>}, {pipeline_mode = #tpu.pipeline_mode<synchronous>, transform_indices = @transform_8, window_bounds = array<i64: 1, 128>}, {transform_indices = @transform_9, window_bounds = array<i64: 8, 10>}]} {
    %c0 = arith.constant 0 : index
    %c0_0 = arith.constant 0 : index
    %0 = vector.load %arg1[%c0, %c0_0] : memref<8x64xf32, #tpu.memory_space<vmem>>, vector<8x64xf32>
    %1 = arith.truncf %0 : vector<8x64xf32> to vector<8x64xbf16>
    %c0_1 = arith.constant 0 : index
    %c0_2 = arith.constant 0 : index
    %2 = vector.load %arg2[%c0_1, %c0_2] : memref<64x256xbf16, #tpu.memory_space<vmem>>, vector<64x256xbf16>
    %cst = arith.constant dense<0.000000e+00> : vector<8x256xf32>
    %3 = tpu.matmul %1, %2, %cst {dimension_numbers = #tpu.dot_dimension_numbers<[1], [0], [0], [1], [0, 0, 1, 1], [], []>} : vector<8x64xbf16>, vector<64x256xbf16>, vector<8x256xf32> -> vector<8x256xf32>
    %c0_3 = arith.constant 0 : index
    %c0_4 = arith.constant 0 : index
    %4 = vector.load %arg3[%c0_3, %c0_4] : memref<1x256xf32, #tpu.memory_space<vmem>>, vector<1x256xf32>
    %5 = vector.broadcast %4 : vector<1x256xf32> to vector<8x256xf32>
    %6 = arith.addf %3, %5 : vector<8x256xf32>
    %cst_5 = arith.constant 0.000000e+00 : f32
    %7 = vector.broadcast %cst_5 : f32 to vector<8x256xf32>
    %8 = arith.maximumf %6, %7 : vector<8x256xf32>
    %9 = arith.truncf %8 : vector<8x256xf32> to vector<8x256xbf16>
    %c0_6 = arith.constant 0 : index
    %c0_7 = arith.constant 0 : index
    %10 = vector.load %arg4[%c0_6, %c0_7] : memref<256x128xbf16, #tpu.memory_space<vmem>>, vector<256x128xbf16>
    %cst_8 = arith.constant dense<0.000000e+00> : vector<8x128xf32>
    %11 = tpu.matmul %9, %10, %cst_8 {dimension_numbers = #tpu.dot_dimension_numbers<[1], [0], [0], [1], [0, 0, 1, 1], [], []>} : vector<8x256xbf16>, vector<256x128xbf16>, vector<8x128xf32> -> vector<8x128xf32>
    %c0_9 = arith.constant 0 : index
    %c0_10 = arith.constant 0 : index
    %12 = vector.load %arg5[%c0_9, %c0_10] : memref<1x128xf32, #tpu.memory_space<vmem>>, vector<1x128xf32>
    %13 = vector.broadcast %12 : vector<1x128xf32> to vector<8x128xf32>
    %14 = arith.addf %11, %13 : vector<8x128xf32>
    %cst_11 = arith.constant 0.000000e+00 : f32
    %15 = vector.broadcast %cst_11 : f32 to vector<8x128xf32>
    %16 = arith.maximumf %14, %15 : vector<8x128xf32>
    %17 = arith.truncf %16 : vector<8x128xf32> to vector<8x128xbf16>
    %c0_12 = arith.constant 0 : index
    %c0_13 = arith.constant 0 : index
    %18 = vector.load %arg6[%c0_12, %c0_13] : memref<128x128xbf16, #tpu.memory_space<vmem>>, vector<128x128xbf16>
    %cst_14 = arith.constant dense<0.000000e+00> : vector<8x128xf32>
    %19 = tpu.matmul %17, %18, %cst_14 {dimension_numbers = #tpu.dot_dimension_numbers<[1], [0], [0], [1], [0, 0, 1, 1], [], []>} : vector<8x128xbf16>, vector<128x128xbf16>, vector<8x128xf32> -> vector<8x128xf32>
    %c0_15 = arith.constant 0 : index
    %c0_16 = arith.constant 0 : index
    %20 = vector.load %arg7[%c0_15, %c0_16] : memref<1x128xf32, #tpu.memory_space<vmem>>, vector<1x128xf32>
    %21 = vector.broadcast %20 : vector<1x128xf32> to vector<8x128xf32>
    %22 = arith.addf %19, %21 : vector<8x128xf32>
    %cst_17 = arith.constant 0.000000e+00 : f32
    %23 = vector.broadcast %cst_17 : f32 to vector<8x128xf32>
    %24 = arith.maximumf %22, %23 : vector<8x128xf32>
    %25 = arith.truncf %24 : vector<8x128xf32> to vector<8x128xbf16>
    %c0_18 = arith.constant 0 : index
    %c0_19 = arith.constant 0 : index
    %26 = vector.load %arg8[%c0_18, %c0_19] : memref<128x128xbf16, #tpu.memory_space<vmem>>, vector<128x128xbf16>
    %cst_20 = arith.constant dense<0.000000e+00> : vector<8x128xf32>
    %27 = tpu.matmul %25, %26, %cst_20 {dimension_numbers = #tpu.dot_dimension_numbers<[1], [0], [0], [1], [0, 0, 1, 1], [], []>} : vector<8x128xbf16>, vector<128x128xbf16>, vector<8x128xf32> -> vector<8x128xf32>
    %c0_21 = arith.constant 0 : index
    %c0_22 = arith.constant 0 : index
    %28 = vector.load %arg9[%c0_21, %c0_22] : memref<1x128xf32, #tpu.memory_space<vmem>>, vector<1x128xf32>
    %29 = vector.broadcast %28 : vector<1x128xf32> to vector<8x128xf32>
    %30 = arith.addf %27, %29 : vector<8x128xf32>
    %cst_23 = arith.constant dense<0xFF800000> : vector<8xf32>
    %31 = vector.multi_reduction <maximumf>, %30, %cst_23 [1] : vector<8x128xf32> to vector<8xf32>
    %32 = vector.shape_cast %31 : vector<8xf32> to vector<8x1xf32>
    %33 = vector.broadcast %32 : vector<8x1xf32> to vector<8x128xf32>
    %34 = arith.subf %30, %33 : vector<8x128xf32>
    %35 = math.exp %34 : vector<8x128xf32>
    %cst_24 = arith.constant dense<0.000000e+00> : vector<8xf32>
    %36 = vector.multi_reduction <add>, %35, %cst_24 [1] : vector<8x128xf32> to vector<8xf32>
    %37 = vector.shape_cast %36 : vector<8xf32> to vector<8x1xf32>
    %38 = tpu.reciprocal %37 {approx = true} : vector<8x1xf32> -> vector<8x1xf32>
    %39 = vector.broadcast %38 : vector<8x1xf32> to vector<8x128xf32>
    %40 = arith.mulf %35, %39 : vector<8x128xf32>
    %41 = vector.extract_strided_slice %40 {offsets = [0, 0], sizes = [8, 10], strides = [1, 1]} : vector<8x128xf32> to vector<8x10xf32>
    %c0_25 = arith.constant 0 : index
    %c0_26 = arith.constant 0 : index
    %42 = vector.load %arg10[%c0_25, %c0_26] : memref<8x10xf32, #tpu.memory_space<vmem>>, vector<8x10xf32>
    tpu.vector_store %arg10[%c0_25, %c0_26], %41 {strides = array<i32>} : memref<8x10xf32, #tpu.memory_space<vmem>>, vector<8x10xf32>,
    return
  }
  func.func @transform_0(%arg0: i32) -> (i32, i32) {
    %c0_i32 = arith.constant 0 : i32
    %c0_i32_0 = arith.constant 0 : i32
    return %arg0, %c0_i32 : i32, i32
  }
  func.func @transform_1(%arg0: i32) -> (i32, i32) {
    %c0_i32 = arith.constant 0 : i32
    %c0_i32_0 = arith.constant 0 : i32
    %c0_i32_1 = arith.constant 0 : i32
    return %c0_i32, %c0_i32_0 : i32, i32
  }
  func.func @transform_2(%arg0: i32) -> (i32, i32) {
    %c0_i32 = arith.constant 0 : i32
    %c0_i32_0 = arith.constant 0 : i32
    %c0_i32_1 = arith.constant 0 : i32
    return %c0_i32, %c0_i32_0 : i32, i32
  }
  func.func @transform_3(%arg0: i32) -> (i32, i32) {
    %c0_i32 = arith.constant 0 : i32
    %c0_i32_0 = arith.constant 0 : i32
    %c0_i32_1 = arith.constant 0 : i32
    return %c0_i32, %c0_i32_0 : i32, i32
  }
  func.func @transform_4(%arg0: i32) -> (i32, i32) {
    %c0_i32 = arith.constant 0 : i32
    %c0_i32_0 = arith.constant 0 : i32
    %c0_i32_1 = arith.constant 0 : i32
    return %c0_i32, %c0_i32_0 : i32, i32
  }
  func.func @transform_5(%arg0: i32) -> (i32, i32) {
    %c0_i32 = arith.constant 0 : i32
    %c0_i32_0 = arith.constant 0 : i32
    %c0_i32_1 = arith.constant 0 : i32
    return %c0_i32, %c0_i32_0 : i32, i32
  }
  func.func @transform_6(%arg0: i32) -> (i32, i32) {
    %c0_i32 = arith.constant 0 : i32
    %c0_i32_0 = arith.constant 0 : i32
    %c0_i32_1 = arith.constant 0 : i32
    return %c0_i32, %c0_i32_0 : i32, i32
  }
  func.func @transform_7(%arg0: i32) -> (i32, i32) {
    %c0_i32 = arith.constant 0 : i32
    %c0_i32_0 = arith.constant 0 : i32
    %c0_i32_1 = arith.constant 0 : i32
    return %c0_i32, %c0_i32_0 : i32, i32
  }
  func.func @transform_8(%arg0: i32) -> (i32, i32) {
    %c0_i32 = arith.constant 0 : i32
    %c0_i32_0 = arith.constant 0 : i32
    %c0_i32_1 = arith.constant 0 : i32
    return %c0_i32, %c0_i32_0 : i32, i32
  }
  func.func @transform_9(%arg0: i32) -> (i32, i32) {
    %c0_i32 = arith.constant 0 : i32
    %c0_i32_0 = arith.constant 0 : i32
    return %arg0, %c0_i32 : i32, i32
  }
}

</mosaic_0001>

<bundles_post_ra>
// kernel: tpu_custom_call.1
= control target key start
LH: loop header
LB: loop body
LE: loop exit
PB: predicated region body
PF: predicated region fallthrough
CT: control target
= control target key end

     0   :  { %14 = vsyncpa [#allocation3], 0  ;;  %s1058_s0 = inlined_call_operand.hbm [shape: f32[8,64], index: 0, kind: input, shape index: {}]   ;;  %s1059_s1 = inlined_call_operand.hbm [shape: bf16[64,256], index: 1, kind: input, shape index: {}]   ;;  %s1060_s2 = inlined_call_operand.hbm [shape: f32[1,256], index: 2, kind: input, shape index: {}]   ;;  %s1061_s3 = inlined_call_operand.hbm [shape: bf16[256,128], index: 3, kind: input, shape index: {}]   ;;  %s1062_s4 = inlined_call_operand.vmem [shape: f32[1,128], index: 4, kind: input, shape index: {}]   ;;  %s1063_s5 = inlined_call_operand.hbm [shape: bf16[128,128], index: 5, kind: input, shape index: {}]   ;;  %s1064_s6 = inlined_call_operand.vmem [shape: f32[1,128], index: 6, kind: input, shape index: {}]   ;;  %s1065_s7 = inlined_call_operand.hbm [shape: bf16[128,128], index: 7, kind: input, shape index: {}]   ;;  %s1066_s8 = inlined_call_operand.vmem [shape: f32[1,128], index: 8, kind: input, shape index: {}]   ;;  %s1067_s9 = inlined_call_operand.hbm [shape: f32[8,10], index: 9, kind: output, shape index: {}]  }
   0x1   :  { %15 = vsyncpa [#allocation6], 0 }
   0x2   :  { %16 = vsyncpa [#allocation9], 0 }
   0x3   :  { %17 = vsyncpa [#allocation12], 0  ;;  %s34_s11 = sshll.u32 %s1059_s1, 4  ;;  %s35_s11 = int_to_ptr.hbm [resolvable:$true] %s34_s11 }
   0x4   :  { %18 = vsyncpa [#allocation4], 0  ;;  %s967_s12 = smov [#allocation5]   ;;  %s58_s16 = sshll.u32 %s1061_s3, 4  ;;  %s59_s16 = int_to_ptr.hbm [resolvable:$true] %s58_s16 }
   0x5   :  { %s36_s13 = sshll.u32 %s967_s12, 4  ;;  %s968_s17 = smov 128   ;;  %s37_s13 = int_to_ptr.vmem [resolvable:$true] %s36_s13 }
   0x6   :  { %s969_s18 = smov 8   ;;  %s970_s19 = smov [#allocation8]  }
   0x7   :  { %42 = dma.hbm_to_vmem [thread:$0]  %s35_s11, 1024, %s37_s13, [#allocation6], %s968_s17, %s968_s17, %s969_s18  }
   0x8   :  { %s60_s20 = sshll.u32 %s970_s19, 4  ;;  %s971_s21 = smov 64   ;;  %s61_s20 = int_to_ptr.vmem [resolvable:$true] %s60_s20 }
   0x9   :  { %s972_s22 = smov 4   ;;  %s24_s24 = sshll.u32 %s1058_s0, 4  ;;  %s25_s24 = int_to_ptr.hbm [resolvable:$true] %s24_s24 }
   0xa   :  { %66 = dma.hbm_to_vmem [thread:$0]  %s59_s16, 2048, %s61_s20, [#allocation9], %s971_s21, %s971_s21, %s972_s22  }
   0xb   :  { %s973_s25 = smov [#allocation2]   ;;  %s48_s28 = sshll.u32 %s1060_s2, 4  ;;  %s49_s28 = int_to_ptr.hbm [resolvable:$true] %s48_s28 }
   0xc   :  { %s26_s26 = sshll.u32 %s973_s25, 4  ;;  %s974_s29 = smov [#allocation7]   ;;  %s27_s26 = int_to_ptr.vmem [resolvable:$true] %s26_s26 }
   0xd   :  { %29 = dma.hbm_to_vmem [thread:$0]  %s25_s24, 128, %s27_s26, [#allocation3]  }
   0xe   :  { %s50_s30 = sshll.u32 %s974_s29, 4  ;;  %s73_s12 = sshll.u32 %s1063_s5, 4  ;;  %s51_s30 = int_to_ptr.vmem [resolvable:$true] %s50_s30  ;;  %s74_s12 = int_to_ptr.hbm [resolvable:$true] %s73_s12 }
   0xf   :  { %53 = dma.hbm_to_vmem [thread:$0]  %s49_s28, 32, %s51_s30, [#allocation6]  }
  0x10   :  { %s88_s14 = sshll.u32 %s1065_s7, 4  ;;  %s975_s15 = smov [#allocation10]   ;;  %s89_s14 = int_to_ptr.hbm [resolvable:$true] %s88_s14 }
  0x11   :  { %s75_s16 = sshll.u32 %s975_s15, 4  ;;  %s976_s2 = smov [#allocation11]   ;;  %s76_s16 = int_to_ptr.vmem [resolvable:$true] %s75_s16 }
  0x12   :  { %81 = dma.hbm_to_vmem [thread:$0]  %s74_s12, 1024, %s76_s16, [#allocation9], %s971_s21, %s971_s21, %s972_s22  }
  0x13   :  { %s90_s17 = sshll.u32 %s976_s2, 4  ;;  %s91_s17 = int_to_ptr.vmem [resolvable:$true] %s90_s17 }
  0x14   :  { %96 = dma.hbm_to_vmem [thread:$0]  %s89_s14, 1024, %s91_s17, [#allocation12], %s971_s21, %s971_s21, %s972_s22  }
  0x15   :  { %957 = dma.done.wait [#allocation3], 128  }
  0x16   :  { %958 = vsyncadd [#allocation3], 4294967168 }
  0x17   :  { %959 = dma.done.wait [#allocation6], 1056  }
  0x18   :  { %960 = vsyncadd [#allocation6], 4294966240 }
  0x19   :  { %961 = dma.done.wait [#allocation9], 3072  }
  0x1a   :  { %962 = vsyncadd [#allocation9], 4294964224 }
  0x1b   :  { %963 = dma.done.wait [#allocation12], 1024  }
  0x1c   :  { %964 = vsyncadd [#allocation12], 4294966272  ;;  %v595_v0 = vld [vmem:[#allocation5 + $0x30] sm:$0xf]  ;;  %v738_v1 = vld [vmem:[#allocation5 + $0x34] sm:$0xf0] }
  0x1d   :  { %v737_v2 = vld [vmem:[#allocation5 + $0x34] sm:$0xf]  ;;  %v596_v3 = vor.u32 %v738_v1, %v595_v0  ;;  %v597_v4 = vld [vmem:[#allocation5 + $0x38] sm:$0xf0]  ;;  %v587_v5 = vld [vmem:[#allocation5 + $0x20] sm:$0xf] }
  0x1e   :  { %v736_v6 = vld [vmem:[#allocation5 + $0x24] sm:$0xf0]  ;;  %v600_v7 = vor.u32 %v737_v2, %v597_v4  ;;  %v735_v8 = vld [vmem:[#allocation5 + $0x24] sm:$0xf]  ;;  %v589_v9 = vld [vmem:[#allocation5 + $0x28] sm:$0xf0] }
  0x1f   :  { %188 = vmatpush.bf16.msra.mxu0 %v596_v3  ;;  %v588_v10 = vor.u32 %v736_v6, %v587_v5  ;;  %v592_v11 = vor.u32 %v735_v8, %v589_v9  ;;  %v579_v12 = vld [vmem:[#allocation5 + $0x10] sm:$0xf]  ;;  %v734_v13 = vld [vmem:[#allocation5 + $0x14] sm:$0xf0]  ;;  %v733_v14 = vld [vmem:[#allocation5 + $0x14] sm:$0xf] }
  0x20   :  { %201 = vmatpush.bf16.msra.mxu1 %v600_v7  ;;  %v581_v15 = vld [vmem:[#allocation5 + $0x18] sm:$0xf0]  ;;  %v580_v18 = vor.u32 %v734_v13, %v579_v12  ;;  %v745_v19 = vld [vmem:[#allocation8 + $0x30] sm:$0xff]  ;;  %v571_v21 = vld [vmem:[#allocation5] sm:$0xf]  ;;  %vm180_vm0 = vcmask 523264  }
  0x21   :  { %v746_v16 = vld [vmem:[#allocation8 + $0x38] sm:$0xff]  ;;  %v584_v20 = vor.u32 %v733_v14, %v581_v15  ;;  %v732_v22 = vld [vmem:[#allocation5 + $0x4] sm:$0xf0]  ;;  %v753_v23 = vld [vmem:[#allocation8 + $0x70] sm:$0xff]  ;;  %s556_s23 = sshll.u32 %s1067_s9, 4  ;;  %vm547_vm1 = vcmask 80896   ;;  %s557_s23 = int_to_ptr.hbm [resolvable:$true] %s556_s23 }
  0x22   :  { %v754_v17 = vld [vmem:[#allocation8 + $0x78] sm:$0xff]  ;;  %346 = vmatpush.bf16.msra.mxu2 %v746_v16  ;;  %v731_v24 = vld [vmem:[#allocation5 + $0x4] sm:$0xf]  ;;  %v573_v25 = vld [vmem:[#allocation5 + $0x8] sm:$0xf0]  ;;  %v572_v26 = vor.u32 %v732_v22, %v571_v21 }
  0x23   :  { %189 = vmatpush.bf16.msra.mxu0 %v588_v10  ;;  %359 = vmatpush.bf16.msra.mxu3 %v754_v17  ;;  %v124_v27 = vld [vmem:[#allocation2] sm:$0xff]  ;;  %v744_v28 = vld [vmem:[#allocation8 + $0x28] sm:$0xff]  ;;  %v576_v29 = vor.u32 %v731_v24, %v573_v25  ;;  %v743_v32 = vld [vmem:[#allocation8 + $0x20] sm:$0xff] }
  0x24   :  { %202 = vmatpush.bf16.msra.mxu1 %v592_v11  ;;  %v752_v30 = vld [vmem:[#allocation8 + $0x68] sm:$0xff]  ;;  %v125_v31 = vpack.c.bf16 %v124_v27, %v124_v27  ;;  %v751_v33 = vld [vmem:[#allocation8 + $0x60] sm:$0xff]  ;;  %v742_v34 = vld [vmem:[#allocation8 + $0x18] sm:$0xff] }
  0x25   :  { %v750_v35 = vld [vmem:[#allocation8 + $0x58] sm:$0xff]  ;;  %v741_v36 = vld [vmem:[#allocation8 + $0x10] sm:$0xff]  ;;  %v740_v38 = vld [vmem:[#allocation8 + $0x8] sm:$0xff] }
  0x26   :  { %347 = vmatpush.bf16.msra.mxu2 %v745_v19  ;;  %v749_v37 = vld [vmem:[#allocation8 + $0x50] sm:$0xff]  ;;  %v748_v39 = vld [vmem:[#allocation8 + $0x48] sm:$0xff]  ;;  %v739_v40 = vld [vmem:[#allocation8] sm:$0xff] }
  0x27   :  { %190 = vmatpush.bf16.msra.mxu0 %v580_v18  ;;  %360 = vmatpush.bf16.msra.mxu3 %v753_v23  ;;  %v747_v41 = vld [vmem:[#allocation8 + $0x40] sm:$0xff]  ;;  %v762_v42 = vld [vmem:[#allocation10 + $0x38] sm:$0xff]  ;;  %v761_v43 = vld [vmem:[#allocation10 + $0x30] sm:$0xff] }
  0x28   :  { %203 = vmatpush.bf16.msra.mxu1 %v584_v20  ;;  %v760_v44 = vld [vmem:[#allocation10 + $0x28] sm:$0xff]  ;;  %v759_v45 = vld [vmem:[#allocation10 + $0x20] sm:$0xff]  ;;  %v758_v46 = vld [vmem:[#allocation10 + $0x18] sm:$0xff] }
  0x29   :  { %v134_v47 = vld [vmem:[#allocation7] sm:$0x3]  ;;  %v757_v48 = vld [vmem:[#allocation10 + $0x10] sm:$0xff]  ;;  %v756_v61 = vld [vmem:[#allocation10 + $0x8] sm:$0xff] }
  0x2a   :  { %348 = vmatpush.bf16.msra.mxu2 %v744_v28  ;;  %v136_v49 = vperm.slane %v134_v47, 0  ;;  %v137_v50 = vperm.slane %v134_v47, 1  ;;  %v755_v62 = vld [vmem:[#allocation10] sm:$0xff]  ;;  %v770_v63 = vld [vmem:[#allocation11 + $0x38] sm:$0xff]  ;;  %v769_v0 = vld [vmem:[#allocation11 + $0x30] sm:$0xff] }
  0x2b   :  { %191 = vmatpush.bf16.msra.mxu0 %v572_v26  ;;  %361 = vmatpush.bf16.msra.mxu3 %v752_v30  ;;  %v768_v1 = vld [vmem:[#allocation11 + $0x28] sm:$0xff]  ;;  %v767_v2 = vld [vmem:[#allocation11 + $0x20] sm:$0xff]  ;;  %v766_v3 = vld [vmem:[#allocation11 + $0x18] sm:$0xff] }
  0x2c   :  { %204 = vmatpush.bf16.msra.mxu1 %v576_v29  ;;  %v765_v4 = vld [vmem:[#allocation11 + $0x10] sm:$0xff]  ;;  %v764_v14 = vld [vmem:[#allocation11 + $0x8] sm:$0xff]  ;;  %v763_v15 = vld [vmem:[#allocation11] sm:$0xff] }
  0x2d   :  { %v782_v5 = vld [vmem:[%s1062_s4] ss:$0 sm:$0xff] }
  0x2e   :  { %601 = vmatmul.msk.bf16.vlgmr.msra.gmra.mxu0 %vm180_vm0, %v125_v31  ;;  %349 = vmatpush.bf16.msra.mxu2 %v743_v32  ;;  %v783_v16 = vld [vmem:[%s1064_s6] ss:$0 sm:$0xff]  ;;  %s977_s6 = smov [#allocation13]  }
  0x2f   :  { %602 = vmatmul.msk.bf16.vlgmr.msra.gmra.mxu1 %vm180_vm0, %v125_v31  ;;  %362 = vmatpush.bf16.msra.mxu3 %v751_v33  ;;  %v784_v22 = vld [vmem:[%s1066_s8] ss:$0 sm:$0xff]  ;;  %s554_s21 = sshll.u32 %s977_s6, 4  ;;  %s555_s21 = int_to_ptr.vmem [resolvable:$true] %s554_s21 }
  0x30   :  { %442 = vmatpush.bf16.msrb.mxu0 %v762_v42  ;;  %525 = vmatpush.bf16.msrb.mxu1 %v770_v63 }
  0x32   :  { %350 = vmatpush.bf16.msra.mxu2 %v742_v34 }
  0x33   :  { %363 = vmatpush.bf16.msra.mxu3 %v750_v35 }
  0x34   :  { %443 = vmatpush.bf16.msrb.mxu0 %v761_v43  ;;  %526 = vmatpush.bf16.msrb.mxu1 %v769_v0 }
  0x36   :  { %351 = vmatpush.bf16.msra.mxu2 %v741_v36 }
  0x37   :  { %364 = vmatpush.bf16.msra.mxu3 %v749_v37 }
  0x38   :  { %444 = vmatpush.bf16.msrb.mxu0 %v760_v44  ;;  %527 = vmatpush.bf16.msrb.mxu1 %v768_v1 }
  0x3a   :  { %352 = vmatpush.bf16.msra.mxu2 %v740_v38 }
  0x3b   :  { %365 = vmatpush.bf16.msra.mxu3 %v748_v39 }
  0x3c   :  { %445 = vmatpush.bf16.msrb.mxu0 %v759_v45  ;;  %528 = vmatpush.bf16.msrb.mxu1 %v767_v2 }
  0x3e   :  { %353 = vmatpush.bf16.msra.mxu2 %v739_v40 }
  0x3f   :  { %366 = vmatpush.bf16.msra.mxu3 %v747_v41 }
  0x40   :  { %446 = vmatpush.bf16.msrb.mxu0 %v758_v46  ;;  %529 = vmatpush.bf16.msrb.mxu1 %v766_v3 }
  0x44   :  { %447 = vmatpush.bf16.msrb.mxu0 %v757_v48  ;;  %530 = vmatpush.bf16.msrb.mxu1 %v765_v4 }
  0x48   :  { %448 = vmatpush.bf16.msrb.mxu0 %v756_v61  ;;  %531 = vmatpush.bf16.msrb.mxu1 %v764_v14 }
  0x4c   :  { %449 = vmatpush.bf16.msrb.mxu0 %v755_v62  ;;  %532 = vmatpush.bf16.msrb.mxu1 %v763_v15 }
  0xab   :  { %v193_v51 = vpop.f32.mrf.mxu0 }
  0xac   :  { %v194_v52 = vadd.f32 %v193_v51, %v136_v49  ;;  %v206_v53 = vpop.f32.mrf.mxu1 }
  0xad   :  { %v207_v54 = vadd.f32 %v206_v53, %v137_v50 }
  0xae   :  { %v210_v55 = vmax.f32 %v194_v52, 0.0 }
  0xaf   :  { %v211_v56 = vmax.f32 %v207_v54, 0.0 }
  0xb0   :  { %v212_v57 = vpack.c.bf16 %v210_v55, %v210_v55 }
  0xb1   :  { %v213_v58 = vpack.c.bf16 %v211_v56, %v211_v56 }
  0xb2   :  { %354 = vmatmul.bf16.vlgmr.msra.gmra.mxu2 %v212_v57 }
  0xb3   :  { %367 = vmatmul.bf16.vlgmr.msra.gmra.mxu3 %v213_v58  ;;  %v195_v59 = vpop.f32.mrf.mxu0 }
  0xb4   :  { %v208_v60 = vpop.f32.mrf.mxu1 }
 0x135   :  { %v355_v6 = vpop.f32.mrf.mxu2 }
 0x136   :  { %v356_v7 = vadd.f32 %v782_v5, %v355_v6  ;;  %v368_v8 = vpop.f32.mrf.mxu3 }
 0x138   :  { %v369_v9 = vadd.f32 %v368_v8, %v356_v7 }
 0x13a   :  { %v372_v10 = vmax.f32 %v369_v9, 0.0 }
 0x13c   :  { %v373_v11 = vpack.c.bf16 %v372_v10, %v372_v10 }
 0x13d   :  { %v357_v12 = vpop.f32.mrf.mxu2 }
 0x13e   :  { %v370_v13 = vpop.f32.mrf.mxu3  ;;  %450 = vmatmul.bf16.vlgmr.msrb.gmra.mxu0 %v373_v11 }
 0x1bb   :  { %v451_v17 = vpop.f32.mrf.mxu0 }
 0x1bc   :  { %v452_v18 = vadd.f32 %v783_v16, %v451_v17 }
 0x1be   :  { %v455_v19 = vmax.f32 %v452_v18, 0.0 }
 0x1c0   :  { %v456_v20 = vpack.c.bf16 %v455_v19, %v455_v19 }
 0x1c2   :  { %533 = vmatmul.bf16.vlgmr.msrb.gmra.mxu1 %v456_v20 }
 0x1c3   :  { %v453_v21 = vpop.f32.mrf.mxu0 }
 0x23f   :  { %v534_v23 = vpop.f32.mrf.mxu1 }
 0x240   :  { %v535_v24 = vadd.f32 %v784_v22, %v534_v23 }
 0x242   :  { %538 = vmax.xlane.f32.xlu0 %v535_v24 }
 0x247   :  { %v536_v25 = vpop.f32.mrf.mxu1 }
 0x2b5   :  { %v539_v26 = vpop.xlane.xlu0 %538 }
 0x2b6   :  { %v540_v27 = vsub.f32 %v535_v24, %v539_v26 }
 0x2b8   :  { %v541_v28 = vmul.f32 1.442695, %v540_v27 }
 0x2ba   :  { %785 = vpow2.f32 %v541_v28 }
 0x2c0   :  { %v786_v29 = vpop.eup %785 }
 0x2c1   :  { %543 = vadd.xlane.f32.xlu0 %v786_v29 }
 0x334   :  { %v544_v30 = vpop.xlane.xlu0 %543 }
 0x335   :  { %787 = vrcp.f32 %v544_v30 }
 0x33b   :  { %v788_v31 = vpop.eup %787 }
 0x33c   :  { %v546_v32 = vmul.f32 %v788_v31, %v786_v29 }
 0x33e   :  { %548 = vst.msk [vmem:[#allocation13] sm:$0xff] %vm547_vm1, %v546_v32 }
 0x33f   :  { %559 = dma.vmem_to_hbm [thread:$0]  %s555_s21, 128, %s557_s23, [#allocation4]  }
 0x340   :  { %965 = dma.done.wait [#allocation4], 128  }
 0x341   :  { %966 = vsyncadd [#allocation4], 4294967168 }
 0x342   :  { %564 = vsyncpa [#allocation3], 1 }
 0x343   :  { %565 = vsyncpa [#allocation6], 1 }
 0x344   :  { %566 = vsyncpa [#allocation9], 1 }
 0x345   :  { %567 = vsyncpa [#allocation12], 1 }
 0x346   :  { %568 = vsyncpa [#allocation4], 1 }

</bundles_post_ra>
